<compile_context>
chip_gen: v7x
topology: tpu7x:2x2x1
jax: 0.10.0
libtpu: 0.0.40
codegen_flags: <defaults>
</compile_context>

<pallas_src>
import functools

import jax
import jax.numpy as jnp
from jax.experimental import pallas as pl
from jax.experimental.pallas import tpu as pltpu


# ------------------------------------------------------------------ helpers

_VMEM_BUDGET = 40 * 1024 * 1024          # working-set budget (safe on v7x 64 MiB physical)
_VMEM_LIMIT_BYTES = 48 * 1024 * 1024     # explicit scoped-VMEM limit for the aggregation


def _round_up(x, m):
    return (x + m - 1) // m * m


def _pick_tiles(n):
    """Padded node count + (row tile tm, reduction tile tk) for aggregation.

    tk: multiple of 256 (full MXU K on v6e), up to 2048.  N is padded up to a
    multiple of tk (never shrink tiles to fit N).
    tm: up to 1024, but small enough that the row grid has >= 2 tiles so the
    "parallel" axis can shard across both v7x TensorCores.
    """
    n = max(n, 1)
    tk = min(2048, _round_up(n, 256))
    n_pad = _round_up(n, tk)

    tm = min(1024, n_pad)
    while tm > 128 and n_pad // tm < 2:       # keep >= 2 row tiles (v7x megacore)
        tm //= 2
    while n_pad % tm != 0:                    # tm must divide n_pad
        tm //= 2
    tm = max(tm, 8)
    return n_pad, tm, tk


# ------------------------------------------------------------------ kernels

def _transform_kernel(x_ref, w_ref, o_ref):
    # XW = X @ W  (bf16 x bf16 -> f32 on the MXU, stored bf16; hoisted out of
    # the aggregation reduction loop, computed once per layer)
    o_ref[...] = jnp.dot(x_ref[...], w_ref[...],
                         preferred_element_type=jnp.float32).astype(o_ref.dtype)


def _aggregate_kernel(a_ref, xw_ref, b_ref, o_ref, acc_ref, *,
                      tk: int, xw_resident: bool,
                      apply_relu: bool, apply_log_softmax: bool, valid_cols: int):
    k = pl.program_id(1)

    @pl.when(k == 0)
    def _():
        acc_ref[...] = jnp.zeros_like(acc_ref)

    if xw_resident:
        # full XW lives in VMEM; slice out this reduction step's K-chunk
        off = pl.multiple_of(k * tk, tk)
        xw = xw_ref[pl.ds(off, tk), :]
    else:
        xw = xw_ref[...]

    # bf16 x bf16 -> f32 accumulate on the MXU
    acc_ref[...] += jnp.dot(a_ref[...], xw, preferred_element_type=jnp.float32)

    @pl.when(k == pl.num_programs(1) - 1)
    def _():
        h = acc_ref[...] + b_ref[...]
        if apply_relu:
            h = jnp.maximum(h, 0.0)
        if apply_log_softmax:
            # mask lane padding so it does not pollute the softmax denominator
            col = jax.lax.broadcasted_iota(jnp.int32, h.shape, 1)
            h = jnp.where(col < valid_cols, h, -1e30)
            m = jnp.max(h, axis=-1, keepdims=True)
            s = h - m
            lse = jnp.log(jnp.sum(jnp.exp(s), axis=-1, keepdims=True))
            h = s - lse
        o_ref[...] = h.astype(o_ref.dtype)


# ------------------------------------------------------------------ pallas wrappers

def feature_transform(x_bf16, w_bf16, *, tm):
    """[N_pad, Cin_pad] @ [Cin_pad, Cout_pad] -> bf16 [N_pad, Cout_pad]."""
    n_pad, cin_pad = x_bf16.shape
    cout_pad = w_bf16.shape[1]
    return pl.pallas_call(
        _transform_kernel,
        out_shape=jax.ShapeDtypeStruct((n_pad, cout_pad), jnp.bfloat16),
        grid_spec=pltpu.PrefetchScalarGridSpec(
            num_scalar_prefetch=0,
            grid=(n_pad // tm,),
            in_specs=[pl.BlockSpec((tm, cin_pad), lambda i: (i, 0)),
                      pl.BlockSpec((cin_pad, cout_pad), lambda i: (0, 0))],
            out_specs=pl.BlockSpec((tm, cout_pad), lambda i: (i, 0))),
        compiler_params=pltpu.CompilerParams(dimension_semantics=("parallel",)),
        cost_estimate=pl.CostEstimate(
            flops=2 * n_pad * cin_pad * cout_pad,
            transcendentals=0,
            bytes_accessed=2 * n_pad * cin_pad + 2 * cin_pad * cout_pad
                           + 2 * n_pad * cout_pad),
    )(x_bf16, w_bf16)


def aggregate(a_hat_bf16, xw_bf16, b_pad, *, tm, tk,
              apply_relu, apply_log_softmax, valid_cols, out_dtype):
    """out = epilogue(A_hat @ XW + b), tiled over (row tiles, reduction tiles)."""
    n_pad = a_hat_bf16.shape[0]
    c_pad = xw_bf16.shape[1]
    out_bytes = jnp.dtype(out_dtype).itemsize

    # VMEM working-set accounting: keep the whole XW resident if it fits the budget
    # (removes the ~N^2-byte XW re-stream); otherwise stream tk-chunks.
    a_block = tm * tk * 2
    out_block = tm * c_pad * out_bytes
    acc_block = tm * c_pad * 4
    bias_block = c_pad * 4
    base = 2 * a_block + 2 * out_block + acc_block + 2 * bias_block
    xw_resident = base + 2 * n_pad * c_pad * 2 <= _VMEM_BUDGET

    if xw_resident:
        xw_spec = pl.BlockSpec((n_pad, c_pad), lambda i, k: (0, 0))
        xw_bytes_read = n_pad * c_pad * 2
    else:
        xw_spec = pl.BlockSpec((tk, c_pad), lambda i, k: (k, 0))
        xw_bytes_read = n_pad * c_pad * 2 * (n_pad // tm)

    kernel = functools.partial(_aggregate_kernel,
                               tk=tk, xw_resident=xw_resident,
                               apply_relu=apply_relu,
                               apply_log_softmax=apply_log_softmax,
                               valid_cols=valid_cols)
    return pl.pallas_call(
        kernel,
        out_shape=jax.ShapeDtypeStruct((n_pad, c_pad), out_dtype),
        grid_spec=pltpu.PrefetchScalarGridSpec(
            num_scalar_prefetch=0,
            grid=(n_pad // tm, n_pad // tk),
            in_specs=[pl.BlockSpec((tm, tk), lambda i, k: (i, k)),
                      xw_spec,
                      pl.BlockSpec((1, c_pad), lambda i, k: (0, 0))],
            out_specs=pl.BlockSpec((tm, c_pad), lambda i, k: (i, 0)),
            scratch_shapes=[pltpu.VMEM((tm, c_pad), jnp.float32)]),
        compiler_params=pltpu.CompilerParams(
            dimension_semantics=("parallel", "arbitrary"),
            vmem_limit_bytes=_VMEM_LIMIT_BYTES),
        cost_estimate=pl.CostEstimate(
            flops=2 * n_pad * n_pad * c_pad,
            transcendentals=(n_pad * c_pad) if apply_log_softmax else 0,
            bytes_accessed=2 * n_pad * n_pad + xw_bytes_read
                           + out_bytes * n_pad * c_pad),
    )(a_hat_bf16, xw_bf16, b_pad)


def gcn_layer(a_hat_bf16, x_bf16, w_bf16, b_pad, *, tm, tk,
              apply_relu, apply_log_softmax, valid_cols, out_dtype):
    xw = feature_transform(x_bf16, w_bf16, tm=tm)
    return aggregate(a_hat_bf16, xw, b_pad, tm=tm, tk=tk,
                     apply_relu=apply_relu,
                     apply_log_softmax=apply_log_softmax,
                     valid_cols=valid_cols, out_dtype=out_dtype)


# ------------------------------------------------------------------ model glue

def glorot(key, shape):
    fan_in, fan_out = shape
    limit = jnp.sqrt(6.0 / (fan_in + fan_out))
    return jax.random.uniform(key, shape, jnp.float32, -limit, limit)


def init_gcn2_params(key, nfeat, nhid, nclass, num_layers):
    dims = [nfeat] + [nhid] * (num_layers - 1) + [nclass]
    params = []
    for i in range(num_layers):
        key, wk = jax.random.split(key)
        w = glorot(wk, (dims[i], dims[i + 1]))
        b = jnp.zeros((dims[i + 1],), jnp.float32)
        params.append((w, b))
    return params


def make_normalized_adj(key, num_nodes, edge_prob=0.15):
    # random symmetric graph + self loops, GCN symmetric normalization
    a = (jax.random.uniform(key, (num_nodes, num_nodes)) < edge_prob).astype(jnp.float32)
    a = jnp.maximum(a, a.T)
    a = a + jnp.eye(num_nodes, dtype=jnp.float32)          # add_self_loops
    deg = jnp.sum(a, axis=1)
    d_inv_sqrt = jax.lax.rsqrt(deg)
    return a * d_inv_sqrt[:, None] * d_inv_sqrt[None, :]   # D^-1/2 (A+I) D^-1/2


def prepare_adjacency(a_hat, num_nodes):
    """Pad + bf16-cast A_hat once, outside the per-call jitted forward."""
    n_pad, _, _ = _pick_tiles(num_nodes)
    a_pad = jnp.zeros((n_pad, n_pad), jnp.float32).at[:num_nodes, :num_nodes].set(a_hat)
    return a_pad.astype(jnp.bfloat16)


def gcn2_forward(x, a_bf16, params):
    n, nfeat = x.shape
    nclass = params[-1][0].shape[1]
    n_pad, tm, tk = _pick_tiles(n)
    assert a_bf16.shape == (n_pad, n_pad)

    # pad nodes + features to a lane-dense layout; activations kept in bf16
    cin_pad = _round_up(nfeat, 128)
    h = jnp.zeros((n_pad, cin_pad), jnp.bfloat16).at[:n, :nfeat].set(
        x.astype(jnp.bfloat16))

    num_layers = len(params)
    for li, (w, b) in enumerate(params):
        cin, cout = w.shape
        ci_pad = _round_up(cin, 128)
        co_pad = _round_up(cout, 128)
        w_pad = jnp.zeros((ci_pad, co_pad), jnp.float32).at[:cin, :cout].set(w)
        w_bf16 = w_pad.astype(jnp.bfloat16)
        b_pad = jnp.zeros((1, co_pad), jnp.float32).at[0, :cout].set(b)
        last = li == num_layers - 1
        h = gcn_layer(a_bf16, h, w_bf16, b_pad, tm=tm, tk=tk,
                      apply_relu=not last, apply_log_softmax=last,
                      valid_cols=cout,
                      out_dtype=jnp.float32 if last else jnp.bfloat16)
    return h[:n, :nclass]


def reference_forward(x, a_hat, params):
    h = x
    for (w, b) in params[:-1]:
        h = jnp.maximum(a_hat @ (h @ w) + b, 0.0)
    w, b = params[-1]
    h = a_hat @ (h @ w) + b
    return jax.nn.log_softmax(h, axis=-1)


# ------------------------------------------------------------------ main

if __name__ == "__main__":
    num_nodes = 64
    nfeat, nhid, nclass = 16, 32, 8
    num_layers = 3

    key = jax.random.PRNGKey(0)
    k_x, k_adj, k_p = jax.random.split(key, 3)

    x = jax.random.normal(k_x, (num_nodes, nfeat), jnp.float32)
    a_hat = make_normalized_adj(k_adj, num_nodes)
    params = init_gcn2_params(k_p, nfeat, nhid, nclass, num_layers)

    # A_hat pad + bf16 cast hoisted out of the per-call forward
    a_bf16 = jax.block_until_ready(prepare_adjacency(a_hat, num_nodes))

    fwd = jax.jit(gcn2_forward)
    out = jax.block_until_ready(fwd(x, a_bf16, params))

    assert out.shape == (num_nodes, nclass)
    # log_softmax rows should sum (in prob space) to ~1
    assert jnp.allclose(jnp.sum(jnp.exp(out), axis=-1), 1.0, atol=1e-4)
    # matches the pure-f32 reference within bf16 streaming tolerance
    ref = reference_forward(x, a_hat, params)
    assert jnp.allclose(out, ref, atol=5e-2, rtol=5e-2)
    print("KERNEL_OK")
</pallas_src>

<mosaic_0001>
module attributes {stable_mosaic.version = 11 : i64} {
  func.func @_aggregate_kernel(%arg0: i32, %arg1: i32, %arg2: memref<128x256xbf16, #tpu.memory_space<vmem>>, %arg3: memref<256x128xbf16, #tpu.memory_space<vmem>>, %arg4: memref<1x128xf32, #tpu.memory_space<vmem>>, %arg5: memref<128x128xbf16, #tpu.memory_space<vmem>>, %arg6: memref<128x128xf32, #tpu.memory_space<vmem>>) attributes {dimension_semantics = [#tpu.dimension_semantics<parallel>, #tpu.dimension_semantics<arbitrary>], iteration_bounds = array<i64: 2, 1>, scalar_prefetch = 0 : i64, scratch_operands = 1 : i64, tpu.core_type = #tpu.core_type<tc>, window_params = [{transform_indices = @transform_0, window_bounds = array<i64: 128, 256>}, {pipeline_mode = #tpu.pipeline_mode<synchronous>, transform_indices = @transform_1, window_bounds = array<i64: 256, 128>}, {pipeline_mode = #tpu.pipeline_mode<synchronous>, transform_indices = @transform_2, window_bounds = array<i64: 1, 128>}, {transform_indices = @transform_3, window_bounds = array<i64: 128, 128>}]} {
    %c0_i32 = arith.constant 0 : i32
    %0 = arith.cmpi eq, %arg1, %c0_i32 : i32
    %1 = arith.extui %0 : i1 to i32
    %c0_i32_0 = arith.constant 0 : i32
    %2 = arith.cmpi ne, %1, %c0_i32_0 : i32
    scf.if %2 {
      %cst_9 = arith.constant 0.000000e+00 : f32
      %15 = vector.broadcast %cst_9 : f32 to vector<128x128xf32>
      %c0_10 = arith.constant 0 : index
      %c0_11 = arith.constant 0 : index
      %16 = vector.load %arg6[%c0_10, %c0_11] : memref<128x128xf32, #tpu.memory_space<vmem>>, vector<128x128xf32>
      tpu.vector_store %arg6[%c0_10, %c0_11], %15 {strides = array<i32>} : memref<128x128xf32, #tpu.memory_space<vmem>>, vector<128x128xf32>,
    } else {
    }
    %c256_i32 = arith.constant 256 : i32
    %3 = arith.muli %arg1, %c256_i32 : i32
    %4 = tpu.assume_multiple %3, 256 : i32
    %5 = arith.index_cast %4 : i32 to index
    %c0 = arith.constant 0 : index
    %6 = vector.load %arg3[%5, %c0] : memref<256x128xbf16, #tpu.memory_space<vmem>>, vector<256x128xbf16>
    %c0_1 = arith.constant 0 : index
    %c0_2 = arith.constant 0 : index
    %7 = vector.load %arg6[%c0_1, %c0_2] : memref<128x128xf32, #tpu.memory_space<vmem>>, vector<128x128xf32>
    %c0_3 = arith.constant 0 : index
    %c0_4 = arith.constant 0 : index
    %8 = vector.load %arg2[%c0_3, %c0_4] : memref<128x256xbf16, #tpu.memory_space<vmem>>, vector<128x256xbf16>
    %cst = arith.constant dense<0.000000e+00> : vector<128x128xf32>
    %9 = tpu.matmul %8, %6, %cst {dimension_numbers = #tpu.dot_dimension_numbers<[1], [0], [0], [1], [0, 0, 1, 1], [], []>} : vector<128x256xbf16>, vector<256x128xbf16>, vector<128x128xf32> -> vector<128x128xf32>
    %10 = arith.addf %7, %9 : vector<128x128xf32>
    %c0_5 = arith.constant 0 : index
    %c0_6 = arith.constant 0 : index
    %11 = vector.load %arg6[%c0_5, %c0_6] : memref<128x128xf32, #tpu.memory_space<vmem>>, vector<128x128xf32>
    tpu.vector_store %arg6[%c0_5, %c0_6], %10 {strides = array<i32>} : memref<128x128xf32, #tpu.memory_space<vmem>>, vector<128x128xf32>,
    %c0_i32_7 = arith.constant 0 : i32
    %12 = arith.cmpi eq, %arg1, %c0_i32_7 : i32
    %13 = arith.extui %12 : i1 to i32
    %c0_i32_8 = arith.constant 0 : i32
    %14 = arith.cmpi ne, %13, %c0_i32_8 : i32
    scf.if %14 {
      %c0_9 = arith.constant 0 : index
      %c0_10 = arith.constant 0 : index
      %15 = vector.load %arg6[%c0_9, %c0_10] : memref<128x128xf32, #tpu.memory_space<vmem>>, vector<128x128xf32>
      %c0_11 = arith.constant 0 : index
      %c0_12 = arith.constant 0 : index
      %16 = vector.load %arg4[%c0_11, %c0_12] : memref<1x128xf32, #tpu.memory_space<vmem>>, vector<1x128xf32>
      %17 = vector.broadcast %16 : vector<1x128xf32> to vector<128x128xf32>
      %18 = arith.addf %15, %17 : vector<128x128xf32>
      %cst_13 = arith.constant 0.000000e+00 : f32
      %19 = vector.broadcast %cst_13 : f32 to vector<128x128xf32>
      %20 = arith.maximumf %18, %19 : vector<128x128xf32>
      %21 = arith.truncf %20 : vector<128x128xf32> to vector<128x128xbf16>
      %c0_14 = arith.constant 0 : index
      %c0_15 = arith.constant 0 : index
      %22 = vector.load %arg5[%c0_14, %c0_15] : memref<128x128xbf16, #tpu.memory_space<vmem>>, vector<128x128xbf16>
      tpu.vector_store %arg5[%c0_14, %c0_15], %21 {strides = array<i32>} : memref<128x128xbf16, #tpu.memory_space<vmem>>, vector<128x128xbf16>,
    } else {
    }
    return
  }
  func.func @transform_0(%arg0: i32, %arg1: i32) -> (i32, i32) {
    %c0_i32 = arith.constant 0 : i32
    return %arg0, %arg1 : i32, i32
  }
  func.func @transform_1(%arg0: i32, %arg1: i32) -> (i32, i32) {
    %c0_i32 = arith.constant 0 : i32
    %c0_i32_0 = arith.constant 0 : i32
    %c0_i32_1 = arith.constant 0 : i32
    return %c0_i32, %c0_i32_0 : i32, i32
  }
  func.func @transform_2(%arg0: i32, %arg1: i32) -> (i32, i32) {
    %c0_i32 = arith.constant 0 : i32
    %c0_i32_0 = arith.constant 0 : i32
    %c0_i32_1 = arith.constant 0 : i32
    return %c0_i32, %c0_i32_0 : i32, i32
  }
  func.func @transform_3(%arg0: i32, %arg1: i32) -> (i32, i32) {
    %c0_i32 = arith.constant 0 : i32
    %c0_i32_0 = arith.constant 0 : i32
    return %arg0, %c0_i32 : i32, i32
  }
}

module attributes {stable_mosaic.version = 11 : i64} {
  func.func @_transform_kernel(%arg0: i32, %arg1: memref<128x128xbf16, #tpu.memory_space<vmem>>, %arg2: memref<128x128xbf16, #tpu.memory_space<vmem>>, %arg3: memref<128x128xbf16, #tpu.memory_space<vmem>>) attributes {dimension_semantics = [#tpu.dimension_semantics<parallel>], iteration_bounds = array<i64: 2>, scalar_prefetch = 0 : i64, scratch_operands = 0 : i64, tpu.core_type = #tpu.core_type<tc>, window_params = [{transform_indices = @transform_0, window_bounds = array<i64: 128, 128>}, {pipeline_mode = #tpu.pipeline_mode<synchronous>, transform_indices = @transform_1, window_bounds = array<i64: 128, 128>}, {transform_indices = @transform_2, window_bounds = array<i64: 128, 128>}]} {
    %c0 = arith.constant 0 : index
    %c0_0 = arith.constant 0 : index
    %0 = vector.load %arg1[%c0, %c0_0] : memref<128x128xbf16, #tpu.memory_space<vmem>>, vector<128x128xbf16>
    %c0_1 = arith.constant 0 : index
    %c0_2 = arith.constant 0 : index
    %1 = vector.load %arg2[%c0_1, %c0_2] : memref<128x128xbf16, #tpu.memory_space<vmem>>, vector<128x128xbf16>
    %cst = arith.constant dense<0.000000e+00> : vector<128x128xf32>
    %2 = tpu.matmul %0, %1, %cst {dimension_numbers = #tpu.dot_dimension_numbers<[1], [0], [0], [1], [0, 0, 1, 1], [], []>} : vector<128x128xbf16>, vector<128x128xbf16>, vector<128x128xf32> -> vector<128x128xf32>
    %3 = arith.truncf %2 : vector<128x128xf32> to vector<128x128xbf16>
    %c0_3 = arith.constant 0 : index
    %c0_4 = arith.constant 0 : index
    %4 = vector.load %arg3[%c0_3, %c0_4] : memref<128x128xbf16, #tpu.memory_space<vmem>>, vector<128x128xbf16>
    tpu.vector_store %arg3[%c0_3, %c0_4], %3 {strides = array<i32>} : memref<128x128xbf16, #tpu.memory_space<vmem>>, vector<128x128xbf16>,
    return
  }
  func.func @transform_0(%arg0: i32) -> (i32, i32) {
    %c0_i32 = arith.constant 0 : i32
    %c0_i32_0 = arith.constant 0 : i32
    return %arg0, %c0_i32 : i32, i32
  }
  func.func @transform_1(%arg0: i32) -> (i32, i32) {
    %c0_i32 = arith.constant 0 : i32
    %c0_i32_0 = arith.constant 0 : i32
    %c0_i32_1 = arith.constant 0 : i32
    return %c0_i32, %c0_i32_0 : i32, i32
  }
  func.func @transform_2(%arg0: i32) -> (i32, i32) {
    %c0_i32 = arith.constant 0 : i32
    %c0_i32_0 = arith.constant 0 : i32
    return %arg0, %c0_i32 : i32, i32
  }
}

module attributes {stable_mosaic.version = 11 : i64} {
  func.func @_aggregate_kernel(%arg0: i32, %arg1: i32, %arg2: memref<128x256xbf16, #tpu.memory_space<vmem>>, %arg3: memref<256x128xbf16, #tpu.memory_space<vmem>>, %arg4: memref<1x128xf32, #tpu.memory_space<vmem>>, %arg5: memref<128x128xf32, #tpu.memory_space<vmem>>, %arg6: memref<128x128xf32, #tpu.memory_space<vmem>>) attributes {dimension_semantics = [#tpu.dimension_semantics<parallel>, #tpu.dimension_semantics<arbitrary>], iteration_bounds = array<i64: 2, 1>, scalar_prefetch = 0 : i64, scratch_operands = 1 : i64, tpu.core_type = #tpu.core_type<tc>, window_params = [{transform_indices = @transform_0, window_bounds = array<i64: 128, 256>}, {pipeline_mode = #tpu.pipeline_mode<synchronous>, transform_indices = @transform_1, window_bounds = array<i64: 256, 128>}, {pipeline_mode = #tpu.pipeline_mode<synchronous>, transform_indices = @transform_2, window_bounds = array<i64: 1, 128>}, {transform_indices = @transform_3, window_bounds = array<i64: 128, 128>}]} {
    %c0_i32 = arith.constant 0 : i32
    %0 = arith.cmpi eq, %arg1, %c0_i32 : i32
    %1 = arith.extui %0 : i1 to i32
    %c0_i32_0 = arith.constant 0 : i32
    %2 = arith.cmpi ne, %1, %c0_i32_0 : i32
    scf.if %2 {
      %cst_9 = arith.constant 0.000000e+00 : f32
      %15 = vector.broadcast %cst_9 : f32 to vector<128x128xf32>
      %c0_10 = arith.constant 0 : index
      %c0_11 = arith.constant 0 : index
      %16 = vector.load %arg6[%c0_10, %c0_11] : memref<128x128xf32, #tpu.memory_space<vmem>>, vector<128x128xf32>
      tpu.vector_store %arg6[%c0_10, %c0_11], %15 {strides = array<i32>} : memref<128x128xf32, #tpu.memory_space<vmem>>, vector<128x128xf32>,
    } else {
    }
    %c256_i32 = arith.constant 256 : i32
    %3 = arith.muli %arg1, %c256_i32 : i32
    %4 = tpu.assume_multiple %3, 256 : i32
    %5 = arith.index_cast %4 : i32 to index
    %c0 = arith.constant 0 : index
    %6 = vector.load %arg3[%5, %c0] : memref<256x128xbf16, #tpu.memory_space<vmem>>, vector<256x128xbf16>
    %c0_1 = arith.constant 0 : index
    %c0_2 = arith.constant 0 : index
    %7 = vector.load %arg6[%c0_1, %c0_2] : memref<128x128xf32, #tpu.memory_space<vmem>>, vector<128x128xf32>
    %c0_3 = arith.constant 0 : index
    %c0_4 = arith.constant 0 : index
    %8 = vector.load %arg2[%c0_3, %c0_4] : memref<128x256xbf16, #tpu.memory_space<vmem>>, vector<128x256xbf16>
    %cst = arith.constant dense<0.000000e+00> : vector<128x128xf32>
    %9 = tpu.matmul %8, %6, %cst {dimension_numbers = #tpu.dot_dimension_numbers<[1], [0], [0], [1], [0, 0, 1, 1], [], []>} : vector<128x256xbf16>, vector<256x128xbf16>, vector<128x128xf32> -> vector<128x128xf32>
    %10 = arith.addf %7, %9 : vector<128x128xf32>
    %c0_5 = arith.constant 0 : index
    %c0_6 = arith.constant 0 : index
    %11 = vector.load %arg6[%c0_5, %c0_6] : memref<128x128xf32, #tpu.memory_space<vmem>>, vector<128x128xf32>
    tpu.vector_store %arg6[%c0_5, %c0_6], %10 {strides = array<i32>} : memref<128x128xf32, #tpu.memory_space<vmem>>, vector<128x128xf32>,
    %c0_i32_7 = arith.constant 0 : i32
    %12 = arith.cmpi eq, %arg1, %c0_i32_7 : i32
    %13 = arith.extui %12 : i1 to i32
    %c0_i32_8 = arith.constant 0 : i32
    %14 = arith.cmpi ne, %13, %c0_i32_8 : i32
    scf.if %14 {
      %c0_9 = arith.constant 0 : index
      %c0_10 = arith.constant 0 : index
      %15 = vector.load %arg6[%c0_9, %c0_10] : memref<128x128xf32, #tpu.memory_space<vmem>>, vector<128x128xf32>
      %c0_11 = arith.constant 0 : index
      %c0_12 = arith.constant 0 : index
      %16 = vector.load %arg4[%c0_11, %c0_12] : memref<1x128xf32, #tpu.memory_space<vmem>>, vector<1x128xf32>
      %17 = vector.broadcast %16 : vector<1x128xf32> to vector<128x128xf32>
      %18 = arith.addf %15, %17 : vector<128x128xf32>
      %19 = tpu.iota {dimensions = array<i32: 1>} : vector<128x128xi32>
      %c8_i32 = arith.constant 8 : i32
      %20 = vector.broadcast %c8_i32 : i32 to vector<128x128xi32>
      %21 = arith.cmpi slt, %19, %20 : vector<128x128xi32>
      %cst_13 = arith.constant -1.000000e+30 : f32
      %22 = vector.broadcast %cst_13 : f32 to vector<128x128xf32>
      %23 = arith.select %21, %18, %22 : vector<128x128xi1>, vector<128x128xf32>
      %cst_14 = arith.constant dense<0xFF800000> : vector<128xf32>
      %24 = vector.multi_reduction <maximumf>, %23, %cst_14 [1] : vector<128x128xf32> to vector<128xf32>
      %25 = vector.shape_cast %24 : vector<128xf32> to vector<128x1xf32>
      %26 = vector.broadcast %25 : vector<128x1xf32> to vector<128x128xf32>
      %27 = arith.subf %23, %26 : vector<128x128xf32>
      %28 = math.exp %27 : vector<128x128xf32>
      %cst_15 = arith.constant dense<0.000000e+00> : vector<128xf32>
      %29 = vector.multi_reduction <add>, %28, %cst_15 [1] : vector<128x128xf32> to vector<128xf32>
      %30 = vector.shape_cast %29 : vector<128xf32> to vector<128x1xf32>
      %31 = math.log %30 : vector<128x1xf32>
      %32 = vector.broadcast %31 : vector<128x1xf32> to vector<128x128xf32>
      %33 = arith.subf %27, %32 : vector<128x128xf32>
      %c0_16 = arith.constant 0 : index
      %c0_17 = arith.constant 0 : index
      %34 = vector.load %arg5[%c0_16, %c0_17] : memref<128x128xf32, #tpu.memory_space<vmem>>, vector<128x128xf32>
      tpu.vector_store %arg5[%c0_16, %c0_17], %33 {strides = array<i32>} : memref<128x128xf32, #tpu.memory_space<vmem>>, vector<128x128xf32>,
    } else {
    }
    return
  }
  func.func @transform_0(%arg0: i32, %arg1: i32) -> (i32, i32) {
    %c0_i32 = arith.constant 0 : i32
    return %arg0, %arg1 : i32, i32
  }
  func.func @transform_1(%arg0: i32, %arg1: i32) -> (i32, i32) {
    %c0_i32 = arith.constant 0 : i32
    %c0_i32_0 = arith.constant 0 : i32
    %c0_i32_1 = arith.constant 0 : i32
    return %c0_i32, %c0_i32_0 : i32, i32
  }
  func.func @transform_2(%arg0: i32, %arg1: i32) -> (i32, i32) {
    %c0_i32 = arith.constant 0 : i32
    %c0_i32_0 = arith.constant 0 : i32
    %c0_i32_1 = arith.constant 0 : i32
    return %c0_i32, %c0_i32_0 : i32, i32
  }
  func.func @transform_3(%arg0: i32, %arg1: i32) -> (i32, i32) {
    %c0_i32 = arith.constant 0 : i32
    %c0_i32_0 = arith.constant 0 : i32
    return %arg0, %c0_i32 : i32, i32
  }
}

</mosaic_0001>

<bundles_post_ra>
// kernel: gcn2_forward.6
= control target key start
LH: loop header
LB: loop body
LE: loop exit
PB: predicated region body
PF: predicated region fallthrough
CT: control target
= control target key end

     0   :  { %s726_s9 = smov 0   ;;  %s784_s0 = inlined_call_operand.vmem [shape: bf16[256,128], index: 0, kind: input, shape index: {}]   ;;  %s785_s1 = inlined_call_operand.vmem [shape: bf16[128,128], index: 1, kind: input, shape index: {}]   ;;  %s786_s2 = inlined_call_operand.vmem [shape: bf16[256,128], index: 2, kind: output, shape index: {}]  }
   0x1 LB: > { %s509_s10 = sadd.s32 4294967295, %s709_s9   ;;  %p513_p0 = scmp.ge.s32.totalorder %s709_s9, 1  ;;  %s709_s9 = sphi %s726_s9, %s12_s9  }
   0x2   : > { %p113_p1 = scmp.lt.s32.totalorder %s709_s9, 3 }
   0x4   : > { %p114_p2 = pnand %p513_p0, %p113_p1 }
   0x5   : > { %v687_v0 = vld [vmem:[%s785_s1] sm:$0xff] (!%p114_p2)   ;;  %s514_s13 = sshll.u32 (!%p114_p2), %s509_s10, 4  ;;  %v688_v1 = vld [vmem:[%s785_s1 + $0x8] sm:$0xff] (!%p114_p2)   ;;  %v689_v2 = vld [vmem:[%s785_s1 + $0x10] sm:$0xff] (!%p114_p2)  }
   0x6   : > { %117 = sbr.rel (%p114_p2) target bundleno = 264 (0x108), region = 28  ;;  %p136_p3 = scmp.lt.s32.totalorder (!%p114_p2), %s514_s13, 31  ;;  %631 = vmatprep.subr.bf16.mxu0 (!%p114_p2), %v687_v0  ;;  %663 = vmatprep.subr.bf16.mxu1 (!%p114_p2), %v687_v0  ;;  %v690_v3 = vld [vmem:[%s785_s1 + $0x18] sm:$0xff] (!%p114_p2)   ;;  %v691_v6 = vld [vmem:[%s785_s1 + $0x20] sm:$0xff] (!%p114_p2)   ;;  %v692_v7 = vld [vmem:[%s785_s1 + $0x28] sm:$0xff] (!%p114_p2)  }
   0x7   : > { %632 = vmatpush3.bf16.msra.mxu0 (!%p114_p2), %v687_v0  ;;  %671 = vmatpush3.bf16.msra.mxu1 (!%p114_p2), %v687_v0  ;;  %v693_v8 = vld [vmem:[%s785_s1 + $0x30] sm:$0xff] (!%p114_p2)   ;;  %v694_v9 = vld [vmem:[%s785_s1 + $0x38] sm:$0xff] (!%p114_p2)  }
   0x8   : > { %633 = vmatprep.subr.bf16.mxu0 (!%p114_p2), %v688_v1  ;;  %664 = vmatprep.subr.bf16.mxu1 (!%p114_p2), %v688_v1 }
   0xb   : > { %634 = vmatpush3.bf16.msra.mxu0 (!%p114_p2), %v688_v1  ;;  %672 = vmatpush3.bf16.msra.mxu1 (!%p114_p2), %v688_v1 }
   0xc   : > { %635 = vmatprep.subr.bf16.mxu0 (!%p114_p2), %v689_v2  ;;  %665 = vmatprep.subr.bf16.mxu1 (!%p114_p2), %v689_v2 }
   0xd   : > { %s788_s13 = smov (!%p136_p3, %s514_s13), 31 }
   0xe   : > { %s515_s18 = sshll.u32 %s788_s13, 2 }
   0xf   : > { %s751_s21 = scalar_lea.vmem %s784_s0, %s515_s18  ;;  %636 = vmatpush3.bf16.msra.mxu0 %v689_v2  ;;  %673 = vmatpush3.bf16.msra.mxu1 %v689_v2  ;;  %s145_s6 = scalar_lea.vmem %s786_s2, %s515_s18 }
  0x10   : > { %v695_v4 = vld [vmem:[%s751_s21] sm:$0xff]   ;;  %637 = vmatprep.subr.bf16.mxu0 %v690_v3  ;;  %666 = vmatprep.subr.bf16.mxu1 %v690_v3  ;;  %v697_v10 = vld [vmem:[%s751_s21 + $0x8] sm:$0xff]   ;;  %v699_v12 = vld [vmem:[%s751_s21 + $0x10] sm:$0xff]  }
  0x11   : > { %v696_v5 = vld [vmem:[%s751_s21 + $0x20] sm:$0xff]   ;;  %647 = vmatprep.mubr.bf16.mxu0 %v695_v4  ;;  %v698_v11 = vld [vmem:[%s751_s21 + $0x28] sm:$0xff]   ;;  %v700_v13 = vld [vmem:[%s751_s21 + $0x30] sm:$0xff]  }
  0x12   : > { %655 = vmatprep.mubr.bf16.mxu1 %v696_v5  ;;  %v701_v14 = vld [vmem:[%s751_s21 + $0x18] sm:$0xff]  }
  0x13   : > { %638 = vmatpush3.bf16.msra.mxu0 %v690_v3  ;;  %674 = vmatpush3.bf16.msra.mxu1 %v690_v3  ;;  %v702_v15 = vld [vmem:[%s751_s21 + $0x38] sm:$0xff]  }
  0x14   : > { %639 = vmatprep.subr.bf16.mxu0 %v691_v6  ;;  %667 = vmatprep.subr.bf16.mxu1 %v691_v6 }
  0x17   : > { %640 = vmatpush3.bf16.msra.mxu0 %v691_v6  ;;  %675 = vmatpush3.bf16.msra.mxu1 %v691_v6 }
  0x18   : > { %641 = vmatprep.subr.bf16.mxu0 %v692_v7  ;;  %668 = vmatprep.subr.bf16.mxu1 %v692_v7 }
  0x1b   : > { %642 = vmatpush3.bf16.msra.mxu0 %v692_v7  ;;  %676 = vmatpush3.bf16.msra.mxu1 %v692_v7 }
  0x1c   : > { %643 = vmatprep.subr.bf16.mxu0 %v693_v8  ;;  %669 = vmatprep.subr.bf16.mxu1 %v693_v8 }
  0x1f   : > { %644 = vmatpush3.bf16.msra.mxu0 %v693_v8  ;;  %677 = vmatpush3.bf16.msra.mxu1 %v693_v8 }
  0x20   : > { %645 = vmatprep.subr.bf16.mxu0 %v694_v9  ;;  %670 = vmatprep.subr.bf16.mxu1 %v694_v9 }
  0x23   : > { %646 = vmatpush3.bf16.msra.mxu0 %v694_v9  ;;  %678 = vmatpush3.bf16.msra.mxu1 %v694_v9 }
  0x26   : > { %648 = vmatmul.mubr.bf16.vlgmr.msra.gmra.mrb[0].mxu0 %v697_v10  ;;  %656 = vmatmul.mubr.bf16.vlgmr.msra.gmra.mrb[0].mxu1 %v698_v11 }
  0x27   : > { %651 = vmatprep.mubr.bf16.mxu0 %v699_v12  ;;  %659 = vmatprep.mubr.bf16.mxu1 %v700_v13 }
  0x2e   : > { %652 = vmatmul.mubr.bf16.gmra.mrb[4].mxu0 %v701_v14  ;;  %660 = vmatmul.mubr.bf16.gmra.mrb[4].mxu1 %v702_v15 }
  0xf9   : > { %v649_v16 = vpop.f32.mrb[0].mxu0  ;;  %v657_v17 = vpop.f32.mrb[0].mxu1 }
  0xfa   : > { %v310_v18 = vpop.f32.mrb[1].mxu0  ;;  %v342_v19 = vpop.f32.mrb[1].mxu1 }
  0xfb   : > { %v650_v20 = vpop.f32.mrb[2].mxu0  ;;  %v658_v21 = vpop.f32.mrb[2].mxu1 }
  0xfc   : > { %v576_v22 = vpack.c.bf16 %v650_v20, %v649_v16  ;;  %v596_v23 = vpack.c.bf16 %v658_v21, %v657_v17  ;;  %v313_v24 = vpop.f32.mrb[3].mxu0  ;;  %v345_v25 = vpop.f32.mrb[3].mxu1 }
  0xfd   : > { %v571_v26 = vpack.c.bf16 %v313_v24, %v310_v18  ;;  %v591_v27 = vpack.c.bf16 %v345_v25, %v342_v19 }
  0xfe   : > { %608 = vst [vmem:[%s145_s6 + $0x8] sm:$0xff] %v576_v22   ;;  %612 = vst [vmem:[%s145_s6 + $0x28] sm:$0xff] %v596_v23  }
  0xff   : > { %572 = vst [vmem:[%s145_s6] sm:$0xff] %v571_v26   ;;  %611 = vst [vmem:[%s145_s6 + $0x20] sm:$0xff] %v591_v27  }
 0x101   : > { %v653_v28 = vpop.f32.mrb[4].mxu0  ;;  %v661_v29 = vpop.f32.mrb[4].mxu1 }
 0x102   : > { %v326_v30 = vpop.f32.mrb[5].mxu0  ;;  %v358_v31 = vpop.f32.mrb[5].mxu1 }
 0x103   : > { %v654_v32 = vpop.f32.mrb[6].mxu0  ;;  %v662_v33 = vpop.f32.mrb[6].mxu1 }
 0x104   : > { %v586_v34 = vpack.c.bf16 %v654_v32, %v653_v28  ;;  %v606_v35 = vpack.c.bf16 %v662_v33, %v661_v29  ;;  %v329_v36 = vpop.f32.mrb[7].mxu0  ;;  %v361_v37 = vpop.f32.mrb[7].mxu1 }
 0x105   : > { %v581_v38 = vpack.c.bf16 %v329_v36, %v326_v30  ;;  %v601_v39 = vpack.c.bf16 %v361_v37, %v358_v31 }
 0x106   : > { %610 = vst [vmem:[%s145_s6 + $0x18] sm:$0xff] %v586_v34   ;;  %614 = vst [vmem:[%s145_s6 + $0x38] sm:$0xff] %v606_v35  }
 0x107   : > { %609 = vst [vmem:[%s145_s6 + $0x10] sm:$0xff] %v581_v38   ;;  %613 = vst [vmem:[%s145_s6 + $0x30] sm:$0xff] %v601_v39  }
 0x108 PF: > { %s12_s9 = sadd.s32 1, %s709_s9  }
 0x109   : > { %p9_p4 = scmp.ge.s32.totalorder %s12_s9, 4  }
 0x10b   :  { %11 = sbr.rel (!%p9_p4) target bundleno = 1 (0x1), region = 58 }

// kernel: gcn2_forward.7
= control target key start
LH: loop header
LB: loop body
LE: loop exit
PB: predicated region body
PF: predicated region fallthrough
CT: control target
= control target key end

     0   :  { %s1124_s12 = smov 0   ;;  %s1126_s13 = smov 0   ;;  %s1258_s0 = inlined_call_operand.vmem [shape: bf16[256,256], index: 0, kind: input, shape index: {}]   ;;  %s1259_s1 = inlined_call_operand.vmem [shape: bf16[256,128], index: 1, kind: input, shape index: {}]   ;;  %s1260_s2 = inlined_call_operand.vmem [shape: f32[1,128], index: 2, kind: input, shape index: {}]   ;;  %s1261_s3 = inlined_call_operand.vmem [shape: bf16[256,128], index: 3, kind: output, shape index: {}]  }
   0x1   :  { %s1128_s14 = smov 0  }
   0x2 LB: > { %s25_s15 = sadd.s32 1, %s1098_s13  ;;  %p815_p0 = scmp.ge.s32.totalorder %s1102_s14, 1  ;;  %s1102_s14 = sphi %s1128_s14, %s13_s14   ;;  %s1098_s13 = sphi %s1126_s13, %s1263_s13   ;;  %s1094_s12 = sphi %s1124_s12, %s1262_s12  }
   0x3   : > { %p27_p1 = scmp.ge.s32.totalorder %s25_s15, 2  ;;  %p158_p2 = scmp.lt.s32.totalorder %s1102_s14, 3 }
   0x5   : > { %s1265_s15 = smov (%p27_p1, %s25_s15), 0  ;;  %p159_p3 = pnand %p815_p0, %p158_p2 }
   0x6   : > { %v1040_v0 = vld [vmem:[%s1259_s1 + $0x40] sm:$0xff] (!%p159_p3)   ;;  %s816_s18 = sshll.u32 (!%p159_p3), %s1094_s12, 4  ;;  %v1042_v2 = vld [vmem:[%s1259_s1 + $0x48] sm:$0xff] (!%p159_p3)   ;;  %v1044_v4 = vld [vmem:[%s1259_s1 + $0x50] sm:$0xff] (!%p159_p3)  }
   0x7   : > { %162 = sbr.rel (%p159_p3) target bundleno = 288 (0x120), region = 32  ;;  %v1041_v1 = vld [vmem:[%s1259_s1] sm:$0xff] (!%p159_p3)   ;;  %936 = vmatprep.subr.bf16.mxu0 (!%p159_p3), %v1040_v0  ;;  %1000 = vmatprep.subr.bf16.mxu1 (!%p159_p3), %v1040_v0  ;;  %v1043_v3 = vld [vmem:[%s1259_s1 + $0x8] sm:$0xff] (!%p159_p3)   ;;  %p189_p4 = scmp.lt.s32.totalorder (!%p159_p3), %s816_s18, 31  ;;  %v1045_v5 = vld [vmem:[%s1259_s1 + $0x10] sm:$0xff] (!%p159_p3)  }
   0x8   : > { %937 = vmatpush3.bf16.msra.mxu0 (!%p159_p3), %v1041_v1  ;;  %1008 = vmatpush3.bf16.msra.mxu1 (!%p159_p3), %v1041_v1  ;;  %v1046_v6 = vld [vmem:[%s1259_s1 + $0x58] sm:$0xff] (!%p159_p3)   ;;  %v1048_v8 = vld [vmem:[%s1259_s1 + $0x60] sm:$0xff] (!%p159_p3)   ;;  %v1050_v10 = vld [vmem:[%s1259_s1 + $0x68] sm:$0xff] (!%p159_p3)  }
   0x9   : > { %938 = vmatprep.subr.bf16.mxu0 (!%p159_p3), %v1042_v2  ;;  %1001 = vmatprep.subr.bf16.mxu1 (!%p159_p3), %v1042_v2  ;;  %v1047_v7 = vld [vmem:[%s1259_s1 + $0x18] sm:$0xff] (!%p159_p3)   ;;  %v1049_v9 = vld [vmem:[%s1259_s1 + $0x20] sm:$0xff] (!%p159_p3)   ;;  %v1051_v13 = vld [vmem:[%s1259_s1 + $0x28] sm:$0xff] (!%p159_p3)  }
   0xa   : > { %v1052_v14 = vld [vmem:[%s1259_s1 + $0x70] sm:$0xff] (!%p159_p3)   ;;  %v1054_v16 = vld [vmem:[%s1259_s1 + $0x78] sm:$0xff] (!%p159_p3)   ;;  %v1217_v35 = vld [vmem:[%s1260_s2] ss:$0 sm:$0xff] (!%p159_p3) }
   0xb   : > { %v1053_v15 = vld [vmem:[%s1259_s1 + $0x30] sm:$0xff] (!%p159_p3)   ;;  %v1055_v17 = vld [vmem:[%s1259_s1 + $0x38] sm:$0xff] (!%p159_p3)  }
   0xc   : > { %939 = vmatpush3.bf16.msra.mxu0 (!%p159_p3), %v1043_v3  ;;  %1009 = vmatpush3.bf16.msra.mxu1 (!%p159_p3), %v1043_v3 }
   0xd   : > { %940 = vmatprep.subr.bf16.mxu0 (!%p159_p3), %v1044_v4  ;;  %1002 = vmatprep.subr.bf16.mxu1 (!%p159_p3), %v1044_v4 }
   0xe   : > { %s1267_s18 = smov (!%p189_p4, %s816_s18), 31 }
   0xf   : > { %s872_s6 = sshll.u32 %s1267_s18, 3  ;;  %s820_s5 = sshll.u32 %s1267_s18, 2 }
  0x10   : > { %941 = vmatpush3.bf16.msra.mxu0 %v1045_v5  ;;  %1010 = vmatpush3.bf16.msra.mxu1 %v1045_v5  ;;  %s1175_s11 = scalar_lea.vmem %s1258_s0, %s872_s6  ;;  %s1227_s8 = scalar_lea.vmem %s1261_s3, %s820_s5 }
  0x11   : > { %942 = vmatprep.subr.bf16.mxu0 %v1046_v6  ;;  %1003 = vmatprep.subr.bf16.mxu1 %v1046_v6  ;;  %v1058_v11 = vld [vmem:[%s1175_s11 + $0x4] ss:$8 sps:$4 sm:$0xff]   ;;  %v1056_v18 = vld [vmem:[%s1175_s11] ss:$8 sps:$4 sm:$0xff]   ;;  %v1062_v20 = vld [vmem:[%s1175_s11 + $0x14] ss:$8 sps:$4 sm:$0xff]  }
  0x12   : > { %v1061_v12 = vld [vmem:[%s1175_s11 + $0x44] ss:$8 sps:$4 sm:$0xff]   ;;  %503 = vmatprep.mubr.bf16.mxu0 %v1058_v11  ;;  %v1059_v19 = vld [vmem:[%s1175_s11 + $0x40] ss:$8 sps:$4 sm:$0xff]   ;;  %v1064_v21 = vld [vmem:[%s1175_s11 + $0x54] ss:$8 sps:$4 sm:$0xff]  }
  0x13   : > { %535 = vmatprep.mubr.bf16.mxu1 %v1061_v12  ;;  %v1066_v22 = vld [vmem:[%s1175_s11 + $0x10] ss:$8 sps:$4 sm:$0xff]   ;;  %v1068_v24 = vld [vmem:[%s1175_s11 + $0x24] ss:$8 sps:$4 sm:$0xff]   ;;  %v1072_v26 = vld [vmem:[%s1175_s11 + $0x20] ss:$8 sps:$4 sm:$0xff]  }
  0x14   : > { %943 = vmatpush3.bf16.msra.mxu0 %v1047_v7  ;;  %1011 = vmatpush3.bf16.msra.mxu1 %v1047_v7  ;;  %v1067_v23 = vld [vmem:[%s1175_s11 + $0x50] ss:$8 sps:$4 sm:$0xff]   ;;  %v1070_v25 = vld [vmem:[%s1175_s11 + $0x64] ss:$8 sps:$4 sm:$0xff]   ;;  %v1073_v27 = vld [vmem:[%s1175_s11 + $0x60] ss:$8 sps:$4 sm:$0xff]  }
  0x15   : > { %944 = vmatprep.subr.bf16.mxu0 %v1048_v8  ;;  %1004 = vmatprep.subr.bf16.mxu1 %v1048_v8  ;;  %v1074_v28 = vld [vmem:[%s1175_s11 + $0x34] ss:$8 sps:$4 sm:$0xff]   ;;  %v1078_v30 = vld [vmem:[%s1175_s11 + $0x30] ss:$8 sps:$4 sm:$0xff]  }
  0x16   : > { %v1076_v29 = vld [vmem:[%s1175_s11 + $0x74] ss:$8 sps:$4 sm:$0xff]   ;;  %v1079_v31 = vld [vmem:[%s1175_s11 + $0x70] ss:$8 sps:$4 sm:$0xff]  }
  0x18   : > { %945 = vmatpush3.bf16.msra.mxu0 %v1049_v9  ;;  %1012 = vmatpush3.bf16.msra.mxu1 %v1049_v9 }
  0x19   : > { %946 = vmatprep.subr.bf16.mxu0 %v1050_v10  ;;  %1005 = vmatprep.subr.bf16.mxu1 %v1050_v10 }
  0x1c   : > { %947 = vmatpush3.bf16.msra.mxu0 %v1051_v13  ;;  %1013 = vmatpush3.bf16.msra.mxu1 %v1051_v13 }
  0x1d   : > { %948 = vmatprep.subr.bf16.mxu0 %v1052_v14  ;;  %1006 = vmatprep.subr.bf16.mxu1 %v1052_v14 }
  0x20   : > { %949 = vmatpush3.bf16.msra.mxu0 %v1053_v15  ;;  %1014 = vmatpush3.bf16.msra.mxu1 %v1053_v15 }
  0x21   : > { %950 = vmatprep.subr.bf16.mxu0 %v1054_v16  ;;  %1007 = vmatprep.subr.bf16.mxu1 %v1054_v16 }
  0x24   : > { %951 = vmatpush3.bf16.msra.mxu0 %v1055_v17  ;;  %1015 = vmatpush3.bf16.msra.mxu1 %v1055_v17 }
  0x27   : > { %504 = vmatmul.mubr.bf16.vlgmr.msra.gmra.mrb[0].mxu0 %v1056_v18  ;;  %536 = vmatmul.mubr.bf16.vlgmr.msra.gmra.mrb[0].mxu1 %v1059_v19 }
  0x28   : > { %511 = vmatprep.mubr.bf16.mxu0 %v1062_v20  ;;  %543 = vmatprep.mubr.bf16.mxu1 %v1064_v21 }
  0x2f   : > { %512 = vmatmul.mubr.bf16.gmra.mrb[4].mxu0 %v1066_v22  ;;  %544 = vmatmul.mubr.bf16.gmra.mrb[4].mxu1 %v1067_v23 }
  0x30   : > { %519 = vmatprep.mubr.bf16.mxu0 %v1068_v24  ;;  %551 = vmatprep.mubr.bf16.mxu1 %v1070_v25 }
  0x37   : > { %520 = vmatmul.mubr.bf16.gmra.mrb[8].mxu0 %v1072_v26  ;;  %552 = vmatmul.mubr.bf16.gmra.mrb[8].mxu1 %v1073_v27 }
  0x38   : > { %527 = vmatprep.mubr.bf16.mxu0 %v1074_v28  ;;  %559 = vmatprep.mubr.bf16.mxu1 %v1076_v29 }
  0x3f   : > { %528 = vmatmul.mubr.bf16.gmra.mrb[12].mxu0 %v1078_v30  ;;  %560 = vmatmul.mubr.bf16.gmra.mrb[12].mxu1 %v1079_v31 }
  0xfa   : > { %v952_v32 = vpop.f32.mrb[0].mxu0  ;;  %v976_v33 = vpop.f32.mrb[0].mxu1 }
  0xfb   : > { %v953_v34 = vpop.f32.mrb[1].mxu0  ;;  %v977_v36 = vpop.f32.mrb[1].mxu1 }
  0xfc   : > { %v954_v37 = vadd.f32 %v953_v34, %v952_v32  ;;  %v978_v38 = vadd.f32 %v977_v36, %v976_v33  ;;  %v955_v39 = vpop.f32.mrb[2].mxu0  ;;  %v979_v40 = vpop.f32.mrb[2].mxu1 }
  0xfd   : > { %v956_v41 = vpop.f32.mrb[3].mxu0  ;;  %v980_v42 = vpop.f32.mrb[3].mxu1 }
  0xfe   : > { %v626_v43 = vadd.f32 %v954_v37, %v1217_v35  ;;  %v634_v44 = vadd.f32 %v978_v38, %v1217_v35  ;;  %v957_v45 = vadd.f32 %v956_v41, %v955_v39  ;;  %v981_v46 = vadd.f32 %v980_v42, %v979_v40 }
 0x100   : > { %v627_v47 = vadd.f32 %v957_v45, %v1217_v35  ;;  %v635_v48 = vadd.f32 %v981_v46, %v1217_v35  ;;  %v642_v49 = vmax.f32 %v626_v43, 0.0  ;;  %v650_v50 = vmax.f32 %v634_v44, 0.0 }
 0x102   : > { %v643_v51 = vmax.f32 %v627_v47, 0.0  ;;  %v651_v52 = vmax.f32 %v635_v48, 0.0  ;;  %v958_v53 = vpop.f32.mrb[4].mxu0  ;;  %v982_v54 = vpop.f32.mrb[4].mxu1 }
 0x103   : > { %v959_v55 = vpop.f32.mrb[5].mxu0  ;;  %v983_v56 = vpop.f32.mrb[5].mxu1 }
 0x104   : > { %v892_v57 = vpack.c.bf16 %v643_v51, %v642_v49  ;;  %v912_v58 = vpack.c.bf16 %v651_v52, %v650_v50  ;;  %v960_v59 = vadd.f32 %v959_v55, %v958_v53  ;;  %v984_v60 = vadd.f32 %v983_v56, %v982_v54  ;;  %v961_v61 = vpop.f32.mrb[6].mxu0  ;;  %v985_v62 = vpop.f32.mrb[6].mxu1 }
 0x105   : > { %v962_v63 = vpop.f32.mrb[7].mxu0  ;;  %v986_v0 = vpop.f32.mrb[7].mxu1 }
 0x106   : > { %893 = vst [vmem:[%s1227_s8] sm:$0xff] %v892_v57   ;;  %932 = vst [vmem:[%s1227_s8 + $0x20] sm:$0xff] %v912_v58   ;;  %v628_v1 = vadd.f32 %v960_v59, %v1217_v35  ;;  %v636_v2 = vadd.f32 %v984_v60, %v1217_v35  ;;  %v963_v3 = vadd.f32 %v962_v63, %v961_v61 }
 0x107   : > { %v987_v4 = vadd.f32 %v986_v0, %v985_v62 }
 0x108   : > { %v629_v5 = vadd.f32 %v963_v3, %v1217_v35  ;;  %v644_v7 = vmax.f32 %v628_v1, 0.0  ;;  %v652_v8 = vmax.f32 %v636_v2, 0.0 }
 0x109   : > { %v637_v6 = vadd.f32 %v987_v4, %v1217_v35 }
 0x10a   : > { %v645_v9 = vmax.f32 %v629_v5, 0.0  ;;  %v964_v11 = vpop.f32.mrb[8].mxu0  ;;  %v988_v12 = vpop.f32.mrb[8].mxu1 }
 0x10b   : > { %v653_v10 = vmax.f32 %v637_v6, 0.0  ;;  %v965_v13 = vpop.f32.mrb[9].mxu0  ;;  %v989_v14 = vpop.f32.mrb[9].mxu1 }
 0x10c   : > { %v897_v15 = vpack.c.bf16 %v645_v9, %v644_v7  ;;  %v966_v17 = vadd.f32 %v965_v13, %v964_v11  ;;  %v990_v18 = vadd.f32 %v989_v14, %v988_v12  ;;  %v967_v19 = vpop.f32.mrb[10].mxu0  ;;  %v991_v20 = vpop.f32.mrb[10].mxu1 }
 0x10d   : > { %v917_v16 = vpack.c.bf16 %v653_v10, %v652_v8  ;;  %v968_v21 = vpop.f32.mrb[11].mxu0  ;;  %v992_v22 = vpop.f32.mrb[11].mxu1 }
 0x10e   : > { %929 = vst [vmem:[%s1227_s8 + $0x8] sm:$0xff] %v897_v15   ;;  %v630_v23 = vadd.f32 %v966_v17, %v1217_v35  ;;  %v638_v24 = vadd.f32 %v990_v18, %v1217_v35  ;;  %v969_v25 = vadd.f32 %v968_v21, %v967_v19  ;;  %v993_v26 = vadd.f32 %v992_v22, %v991_v20 }
 0x10f   : > { %933 = vst [vmem:[%s1227_s8 + $0x28] sm:$0xff] %v917_v16  }
 0x110   : > { %v631_v27 = vadd.f32 %v969_v25, %v1217_v35  ;;  %v639_v28 = vadd.f32 %v993_v26, %v1217_v35  ;;  %v646_v29 = vmax.f32 %v630_v23, 0.0  ;;  %v654_v30 = vmax.f32 %v638_v24, 0.0 }
 0x112   : > { %v647_v31 = vmax.f32 %v631_v27, 0.0  ;;  %v655_v32 = vmax.f32 %v639_v28, 0.0  ;;  %v970_v33 = vpop.f32.mrb[12].mxu0  ;;  %v994_v34 = vpop.f32.mrb[12].mxu1 }
 0x113   : > { %v971_v36 = vpop.f32.mrb[13].mxu0  ;;  %v995_v37 = vpop.f32.mrb[13].mxu1 }
 0x114   : > { %v902_v38 = vpack.c.bf16 %v647_v31, %v646_v29  ;;  %v922_v39 = vpack.c.bf16 %v655_v32, %v654_v30  ;;  %v972_v40 = vadd.f32 %v971_v36, %v970_v33  ;;  %v996_v41 = vadd.f32 %v995_v37, %v994_v34  ;;  %v973_v42 = vpop.f32.mrb[14].mxu0  ;;  %v997_v43 = vpop.f32.mrb[14].mxu1 }
 0x115   : > { %v974_v44 = vpop.f32.mrb[15].mxu0  ;;  %v998_v45 = vpop.f32.mrb[15].mxu1 }
 0x116   : > { %930 = vst [vmem:[%s1227_s8 + $0x10] sm:$0xff] %v902_v38   ;;  %934 = vst [vmem:[%s1227_s8 + $0x30] sm:$0xff] %v922_v39   ;;  %v632_v46 = vadd.f32 %v972_v40, %v1217_v35  ;;  %v640_v47 = vadd.f32 %v996_v41, %v1217_v35  ;;  %v975_v48 = vadd.f32 %v974_v44, %v973_v42 }
 0x117   : > { %v999_v49 = vadd.f32 %v998_v45, %v997_v43 }
 0x118   : > { %v633_v50 = vadd.f32 %v975_v48, %v1217_v35  ;;  %v648_v52 = vmax.f32 %v632_v46, 0.0  ;;  %v656_v53 = vmax.f32 %v640_v47, 0.0 }
 0x119   : > { %v641_v51 = vadd.f32 %v999_v49, %v1217_v35 }
 0x11a   : > { %v649_v54 = vmax.f32 %v633_v50, 0.0 }
 0x11b   : > { %v657_v55 = vmax.f32 %v641_v51, 0.0 }
 0x11c   : > { %v907_v56 = vpack.c.bf16 %v649_v54, %v648_v52 }
 0x11d   : > { %v927_v57 = vpack.c.bf16 %v657_v55, %v656_v53 }
 0x11e   : > { %931 = vst [vmem:[%s1227_s8 + $0x18] sm:$0xff] %v907_v56  }
 0x11f   : > { %935 = vst [vmem:[%s1227_s8 + $0x38] sm:$0xff] %v927_v57  }
 0x120 PF: > { %s13_s14 = sadd.s32 1, %s1102_s14   ;;  %s1262_s12 = smov %s1098_s13 }
 0x121   : > { %p10_p5 = scmp.ge.s32.totalorder %s13_s14, 4   ;;  %s1263_s13 = smov %s1265_s15 }
 0x123   :  { %12 = sbr.rel (!%p10_p5) target bundleno = 2 (0x2), region = 71 }

// kernel: gcn2_forward.11
= control target key start
LH: loop header
LB: loop body
LE: loop exit
PB: predicated region body
PF: predicated region fallthrough
CT: control target
= control target key end

     0   :  { %s1208_s12 = smov 0   ;;  %s1210_s13 = smov 0   ;;  %s1516_s0 = inlined_call_operand.vmem [shape: bf16[256,256], index: 0, kind: input, shape index: {}]   ;;  %s1517_s1 = inlined_call_operand.vmem [shape: bf16[256,128], index: 1, kind: input, shape index: {}]   ;;  %s1518_s2 = inlined_call_operand.vmem [shape: f32[1,128], index: 2, kind: input, shape index: {}]   ;;  %s1519_s3 = inlined_call_operand.vmem [shape: f32[256,128], index: 3, kind: output, shape index: {}]  }
   0x1   :  { %s1212_s14 = smov 0  }
   0x2 LB: > { %s25_s15 = sadd.s32 1, %s1182_s13  ;;  %p914_p0 = scmp.ge.s32.totalorder %s1186_s14, 1  ;;  %s1186_s14 = sphi %s1212_s14, %s13_s14   ;;  %s1182_s13 = sphi %s1210_s13, %s1521_s13   ;;  %s1178_s12 = sphi %s1208_s12, %s1520_s12  }
   0x3   : > { %p27_p1 = scmp.ge.s32.totalorder %s25_s15, 2  ;;  %p158_p2 = scmp.lt.s32.totalorder %s1186_s14, 3 }
   0x5   : > { %s1523_s15 = smov (%p27_p1, %s25_s15), 0  ;;  %p159_p3 = pnand %p914_p0, %p158_p2 }
   0x6   : > { %v1060_v0 = vld [vmem:[%s1517_s1 + $0x40] sm:$0xff] (!%p159_p3)   ;;  %s915_s18 = sshll.u32 (!%p159_p3), %s1178_s12, 4  ;;  %v1062_v2 = vld [vmem:[%s1517_s1 + $0x48] sm:$0xff] (!%p159_p3)   ;;  %v1064_v4 = vld [vmem:[%s1517_s1 + $0x50] sm:$0xff] (!%p159_p3)   ;;  %v642_v32 = vlaneseq (!%p159_p3) }
   0x7   : > { %162 = sbr.rel (%p159_p3) target bundleno = 609 (0x261), region = 32  ;;  %v1061_v1 = vld [vmem:[%s1517_s1] sm:$0xff] (!%p159_p3)   ;;  %956 = vmatprep.subr.bf16.mxu0 (!%p159_p3), %v1060_v0  ;;  %1020 = vmatprep.subr.bf16.mxu1 (!%p159_p3), %v1060_v0  ;;  %v1063_v3 = vld [vmem:[%s1517_s1 + $0x8] sm:$0xff] (!%p159_p3)   ;;  %p189_p4 = scmp.lt.s32.totalorder (!%p159_p3), %s915_s18, 31  ;;  %v1065_v5 = vld [vmem:[%s1517_s1 + $0x10] sm:$0xff] (!%p159_p3)  }
   0x8   : > { %957 = vmatpush3.bf16.msra.mxu0 (!%p159_p3), %v1061_v1  ;;  %1028 = vmatpush3.bf16.msra.mxu1 (!%p159_p3), %v1061_v1  ;;  %v1066_v6 = vld [vmem:[%s1517_s1 + $0x58] sm:$0xff] (!%p159_p3)   ;;  %v1068_v8 = vld [vmem:[%s1517_s1 + $0x60] sm:$0xff] (!%p159_p3)   ;;  %v1070_v10 = vld [vmem:[%s1517_s1 + $0x68] sm:$0xff] (!%p159_p3)   ;;  %v1300_v33 = vand.u32 (!%p159_p3), 127, %v642_v32 }
   0x9   : > { %958 = vmatprep.subr.bf16.mxu0 (!%p159_p3), %v1062_v2  ;;  %1021 = vmatprep.subr.bf16.mxu1 (!%p159_p3), %v1062_v2  ;;  %v1067_v7 = vld [vmem:[%s1517_s1 + $0x18] sm:$0xff] (!%p159_p3)   ;;  %v1069_v9 = vld [vmem:[%s1517_s1 + $0x20] sm:$0xff] (!%p159_p3)   ;;  %v1071_v13 = vld [vmem:[%s1517_s1 + $0x28] sm:$0xff] (!%p159_p3)  }
   0xa   : > { %v1072_v14 = vld [vmem:[%s1517_s1 + $0x70] sm:$0xff] (!%p159_p3)   ;;  %v1074_v16 = vld [vmem:[%s1517_s1 + $0x78] sm:$0xff] (!%p159_p3)   ;;  %v1305_v38 = vld [vmem:[%s1518_s2] ss:$0 sm:$0xff] (!%p159_p3)  ;;  %vm644_vm0 = vcmp.lt.s32.totalorder (!%p159_p3), %v1300_v33, 8 }
   0xb   : > { %v1073_v15 = vld [vmem:[%s1517_s1 + $0x30] sm:$0xff] (!%p159_p3)   ;;  %v1075_v17 = vld [vmem:[%s1517_s1 + $0x38] sm:$0xff] (!%p159_p3)  }
   0xc   : > { %959 = vmatpush3.bf16.msra.mxu0 (!%p159_p3), %v1063_v3  ;;  %1029 = vmatpush3.bf16.msra.mxu1 (!%p159_p3), %v1063_v3 }
   0xd   : > { %960 = vmatprep.subr.bf16.mxu0 (!%p159_p3), %v1064_v4  ;;  %1022 = vmatprep.subr.bf16.mxu1 (!%p159_p3), %v1064_v4 }
   0xe   : > { %s1525_s18 = smov (!%p189_p4, %s915_s18), 31 }
   0xf   : > { %s955_s6 = sshll.u32 %s1525_s18, 3 }
  0x10   : > { %961 = vmatpush3.bf16.msra.mxu0 %v1065_v5  ;;  %1030 = vmatpush3.bf16.msra.mxu1 %v1065_v5  ;;  %s1261_s11 = scalar_lea.vmem %s1516_s0, %s955_s6  ;;  %s1473_s8 = scalar_lea.vmem %s1519_s3, %s955_s6 }
  0x11   : > { %962 = vmatprep.subr.bf16.mxu0 %v1066_v6  ;;  %1023 = vmatprep.subr.bf16.mxu1 %v1066_v6  ;;  %v1078_v11 = vld [vmem:[%s1261_s11 + $0x4] ss:$8 sps:$4 sm:$0xff]   ;;  %v1076_v18 = vld [vmem:[%s1261_s11] ss:$8 sps:$4 sm:$0xff]   ;;  %v1082_v20 = vld [vmem:[%s1261_s11 + $0x14] ss:$8 sps:$4 sm:$0xff]  }
  0x12   : > { %v1081_v12 = vld [vmem:[%s1261_s11 + $0x44] ss:$8 sps:$4 sm:$0xff]   ;;  %503 = vmatprep.mubr.bf16.mxu0 %v1078_v11  ;;  %v1079_v19 = vld [vmem:[%s1261_s11 + $0x40] ss:$8 sps:$4 sm:$0xff]   ;;  %v1085_v21 = vld [vmem:[%s1261_s11 + $0x54] ss:$8 sps:$4 sm:$0xff]  }
  0x13   : > { %535 = vmatprep.mubr.bf16.mxu1 %v1081_v12  ;;  %v1084_v22 = vld [vmem:[%s1261_s11 + $0x10] ss:$8 sps:$4 sm:$0xff]   ;;  %v1088_v24 = vld [vmem:[%s1261_s11 + $0x24] ss:$8 sps:$4 sm:$0xff]   ;;  %v1090_v26 = vld [vmem:[%s1261_s11 + $0x20] ss:$8 sps:$4 sm:$0xff]  }
  0x14   : > { %963 = vmatpush3.bf16.msra.mxu0 %v1067_v7  ;;  %1031 = vmatpush3.bf16.msra.mxu1 %v1067_v7  ;;  %v1087_v23 = vld [vmem:[%s1261_s11 + $0x50] ss:$8 sps:$4 sm:$0xff]   ;;  %v1091_v25 = vld [vmem:[%s1261_s11 + $0x64] ss:$8 sps:$4 sm:$0xff]   ;;  %v1093_v27 = vld [vmem:[%s1261_s11 + $0x60] ss:$8 sps:$4 sm:$0xff]  }
  0x15   : > { %964 = vmatprep.subr.bf16.mxu0 %v1068_v8  ;;  %1024 = vmatprep.subr.bf16.mxu1 %v1068_v8  ;;  %v1094_v28 = vld [vmem:[%s1261_s11 + $0x34] ss:$8 sps:$4 sm:$0xff]   ;;  %v1096_v30 = vld [vmem:[%s1261_s11 + $0x30] ss:$8 sps:$4 sm:$0xff]  }
  0x16   : > { %v1097_v29 = vld [vmem:[%s1261_s11 + $0x74] ss:$8 sps:$4 sm:$0xff]   ;;  %v1099_v31 = vld [vmem:[%s1261_s11 + $0x70] ss:$8 sps:$4 sm:$0xff]  }
  0x18   : > { %965 = vmatpush3.bf16.msra.mxu0 %v1069_v9  ;;  %1032 = vmatpush3.bf16.msra.mxu1 %v1069_v9 }
  0x19   : > { %966 = vmatprep.subr.bf16.mxu0 %v1070_v10  ;;  %1025 = vmatprep.subr.bf16.mxu1 %v1070_v10 }
  0x1c   : > { %967 = vmatpush3.bf16.msra.mxu0 %v1071_v13  ;;  %1033 = vmatpush3.bf16.msra.mxu1 %v1071_v13 }
  0x1d   : > { %968 = vmatprep.subr.bf16.mxu0 %v1072_v14  ;;  %1026 = vmatprep.subr.bf16.mxu1 %v1072_v14 }
  0x20   : > { %969 = vmatpush3.bf16.msra.mxu0 %v1073_v15  ;;  %1034 = vmatpush3.bf16.msra.mxu1 %v1073_v15 }
  0x21   : > { %970 = vmatprep.subr.bf16.mxu0 %v1074_v16  ;;  %1027 = vmatprep.subr.bf16.mxu1 %v1074_v16 }
  0x24   : > { %971 = vmatpush3.bf16.msra.mxu0 %v1075_v17  ;;  %1035 = vmatpush3.bf16.msra.mxu1 %v1075_v17 }
  0x27   : > { %504 = vmatmul.mubr.bf16.vlgmr.msra.gmra.mrb[0].mxu0 %v1076_v18  ;;  %536 = vmatmul.mubr.bf16.vlgmr.msra.gmra.mrb[0].mxu1 %v1079_v19 }
  0x28   : > { %511 = vmatprep.mubr.bf16.mxu0 %v1082_v20  ;;  %543 = vmatprep.mubr.bf16.mxu1 %v1085_v21 }
  0x2f   : > { %512 = vmatmul.mubr.bf16.gmra.mrb[4].mxu0 %v1084_v22  ;;  %544 = vmatmul.mubr.bf16.gmra.mrb[4].mxu1 %v1087_v23 }
  0x30   : > { %519 = vmatprep.mubr.bf16.mxu0 %v1088_v24  ;;  %551 = vmatprep.mubr.bf16.mxu1 %v1091_v25 }
  0x37   : > { %520 = vmatmul.mubr.bf16.gmra.mrb[8].mxu0 %v1090_v26  ;;  %552 = vmatmul.mubr.bf16.gmra.mrb[8].mxu1 %v1093_v27 }
  0x38   : > { %527 = vmatprep.mubr.bf16.mxu0 %v1094_v28  ;;  %559 = vmatprep.mubr.bf16.mxu1 %v1097_v29 }
  0x3f   : > { %528 = vmatmul.mubr.bf16.gmra.mrb[12].mxu0 %v1096_v30  ;;  %560 = vmatmul.mubr.bf16.gmra.mrb[12].mxu1 %v1099_v31 }
  0xfa   : > { %v972_v34 = vpop.f32.mrb[0].mxu0  ;;  %v996_v35 = vpop.f32.mrb[0].mxu1 }
  0xfb   : > { %v973_v36 = vpop.f32.mrb[1].mxu0  ;;  %v997_v37 = vpop.f32.mrb[1].mxu1 }
  0xfc   : > { %v974_v39 = vadd.f32 %v973_v36, %v972_v34  ;;  %v998_v40 = vadd.f32 %v997_v37, %v996_v35  ;;  %v975_v41 = vpop.f32.mrb[2].mxu0  ;;  %v999_v42 = vpop.f32.mrb[2].mxu1 }
  0xfd   : > { %v976_v43 = vpop.f32.mrb[3].mxu0  ;;  %v1000_v44 = vpop.f32.mrb[3].mxu1 }
  0xfe   : > { %v977_v45 = vadd.f32 %v976_v43, %v975_v41  ;;  %v1001_v46 = vadd.f32 %v1000_v44, %v999_v42  ;;  %v626_v47 = vadd.f32 %v974_v39, %v1305_v38  ;;  %v634_v48 = vadd.f32 %v998_v40, %v1305_v38 }
 0x100   : > { %v1312_v49 = vsel %vm644_vm0, %v626_v47, -1e+30  ;;  %v635_v50 = vadd.f32 %v1001_v46, %v1305_v38  ;;  %v1322_v53 = vsel %vm644_vm0, %v634_v48, -1e+30  ;;  %v627_v60 = vadd.f32 %v977_v45, %v1305_v38 }
 0x101   : > { %661 = vmax.xlane.f32.xlu0 %v1312_v49 }
 0x102   : > { %v978_v51 = vpop.f32.mrb[4].mxu0  ;;  %v1318_v52 = vsel %vm644_vm0, %v635_v50, -1e+30  ;;  %v1002_v54 = vpop.f32.mrb[4].mxu1  ;;  %v1335_v5 = vsel %vm644_vm0, %v627_v60, -1e+30 }
 0x103   : > { %679 = vmax.xlane.f32.xlu1 %v1318_v52  ;;  %v979_v55 = vpop.f32.mrb[5].mxu0  ;;  %v1003_v56 = vpop.f32.mrb[5].mxu1 }
 0x104   : > { %v980_v57 = vadd.f32 %v979_v55, %v978_v51  ;;  %v981_v58 = vpop.f32.mrb[6].mxu0  ;;  %v1004_v59 = vadd.f32 %v1003_v56, %v1002_v54  ;;  %v1005_v61 = vpop.f32.mrb[6].mxu1 }
 0x105   : > { %677 = vmax.xlane.f32.xlu0 %v1322_v53  ;;  %v982_v62 = vpop.f32.mrb[7].mxu0  ;;  %v1006_v63 = vpop.f32.mrb[7].mxu1 }
 0x106   : > { %v983_v0 = vadd.f32 %v982_v62, %v981_v58  ;;  %v628_v1 = vadd.f32 %v980_v57, %v1305_v38  ;;  %v1007_v2 = vadd.f32 %v1006_v63, %v1005_v61  ;;  %v636_v3 = vadd.f32 %v1004_v59, %v1305_v38 }
 0x108   : > { %v1331_v4 = vsel %vm644_vm0, %v628_v1, -1e+30  ;;  %v629_v6 = vadd.f32 %v983_v0, %v1305_v38  ;;  %v637_v7 = vadd.f32 %v1007_v2, %v1305_v38  ;;  %v1347_v10 = vsel %vm644_vm0, %v636_v3, -1e+30 }
 0x109   : > { %665 = vmax.xlane.f32.xlu1 %v1331_v4  ;;  %663 = vmax.xlane.f32.xlu0 %v1335_v5 }
 0x10a   : > { %v984_v8 = vpop.f32.mrb[8].mxu0  ;;  %v1343_v9 = vsel %vm644_vm0, %v629_v6, -1e+30  ;;  %v1008_v11 = vpop.f32.mrb[8].mxu1  ;;  %v1353_v19 = vsel %vm644_vm0, %v637_v7, -1e+30 }
 0x10b   : > { %v985_v12 = vpop.f32.mrb[9].mxu0  ;;  %v1009_v13 = vpop.f32.mrb[9].mxu1 }
 0x10c   : > { %v986_v14 = vadd.f32 %v985_v12, %v984_v8  ;;  %v987_v15 = vpop.f32.mrb[10].mxu0  ;;  %v1010_v16 = vadd.f32 %v1009_v13, %v1008_v11  ;;  %v1011_v17 = vpop.f32.mrb[10].mxu1 }
 0x10d   : > { %667 = vmax.xlane.f32.xlu1 %v1343_v9  ;;  %681 = vmax.xlane.f32.xlu0 %v1347_v10  ;;  %v988_v18 = vpop.f32.mrb[11].mxu0  ;;  %v1012_v20 = vpop.f32.mrb[11].mxu1 }
 0x10e   : > { %v989_v21 = vadd.f32 %v988_v18, %v987_v15  ;;  %v630_v22 = vadd.f32 %v986_v14, %v1305_v38  ;;  %v1013_v23 = vadd.f32 %v1012_v20, %v1011_v17  ;;  %v638_v24 = vadd.f32 %v1010_v16, %v1305_v38 }
 0x110   : > { %v1359_v25 = vsel %vm644_vm0, %v630_v22, -1e+30  ;;  %v631_v26 = vadd.f32 %v989_v21, %v1305_v38  ;;  %v639_v27 = vadd.f32 %v1013_v23, %v1305_v38  ;;  %v1371_v30 = vsel %vm644_vm0, %v638_v24, -1e+30 }
 0x111   : > { %683 = vmax.xlane.f32.xlu1 %v1353_v19  ;;  %669 = vmax.xlane.f32.xlu0 %v1359_v25 }
 0x112   : > { %v990_v28 = vpop.f32.mrb[12].mxu0  ;;  %v1367_v29 = vsel %vm644_vm0, %v631_v26, -1e+30  ;;  %v1014_v31 = vpop.f32.mrb[12].mxu1  ;;  %v1377_v41 = vsel %vm644_vm0, %v639_v27, -1e+30 }
 0x113   : > { %v991_v32 = vpop.f32.mrb[13].mxu0  ;;  %v1015_v34 = vpop.f32.mrb[13].mxu1 }
 0x114   : > { %v992_v35 = vadd.f32 %v991_v32, %v990_v28  ;;  %v993_v36 = vpop.f32.mrb[14].mxu0  ;;  %v1016_v37 = vadd.f32 %v1015_v34, %v1014_v31  ;;  %v1017_v39 = vpop.f32.mrb[14].mxu1 }
 0x115   : > { %671 = vmax.xlane.f32.xlu1 %v1367_v29  ;;  %685 = vmax.xlane.f32.xlu0 %v1371_v30  ;;  %v994_v40 = vpop.f32.mrb[15].mxu0  ;;  %v1018_v42 = vpop.f32.mrb[15].mxu1 }
 0x116   : > { %v995_v43 = vadd.f32 %v994_v40, %v993_v36  ;;  %v632_v44 = vadd.f32 %v992_v35, %v1305_v38  ;;  %v1019_v45 = vadd.f32 %v1018_v42, %v1017_v39  ;;  %v640_v46 = vadd.f32 %v1016_v37, %v1305_v38 }
 0x118   : > { %v1383_v47 = vsel %vm644_vm0, %v632_v44, -1e+30  ;;  %v633_v48 = vadd.f32 %v995_v43, %v1305_v38  ;;  %v1394_v51 = vsel %vm644_vm0, %v640_v46, -1e+30  ;;  %v641_v54 = vadd.f32 %v1019_v45, %v1305_v38 }
 0x119   : > { %687 = vmax.xlane.f32.xlu1 %v1377_v41  ;;  %673 = vmax.xlane.f32.xlu0 %v1383_v47 }
 0x11a   : > { %v1390_v50 = vsel %vm644_vm0, %v633_v48, -1e+30  ;;  %v1401_v55 = vsel %vm644_vm0, %v641_v54, -1e+30 }
 0x11d   : > { %675 = vmax.xlane.f32.xlu1 %v1390_v50  ;;  %689 = vmax.xlane.f32.xlu0 %v1394_v51 }
 0x121   : > { %691 = vmax.xlane.f32.xlu1 %v1401_v55 }
 0x18e   : > { %v662_v56 = vpop.xlane.xlu0 %661 }
 0x18f   : > { %v1405_v57 = vsub.f32 %v1312_v49, %v662_v56 }
 0x190   : > { %v680_v59 = vpop.xlane.xlu1 %679 }
 0x191   : > { %v709_v58 = vmul.f32 1.442695, %v1405_v57  ;;  %v1413_v63 = vsub.f32 %v1318_v52, %v680_v59 }
 0x192   : > { %v678_v60 = vpop.xlane.xlu0 %677 }
 0x193   : > { %1100 = vpow2.f32 %v709_v58  ;;  %v1409_v38 = vsub.f32 %v1322_v53, %v678_v60  ;;  %v727_v6 = vmul.f32 1.442695, %v1413_v63 }
 0x195   : > { %v725_v61 = vmul.f32 1.442695, %v1409_v38 }
 0x196   : > { %v666_v62 = vpop.xlane.xlu1 %665  ;;  %v664_v33 = vpop.xlane.xlu0 %663 }
 0x197   : > { %1102 = vpow2.f32 %v725_v61  ;;  %v1416_v0 = vsub.f32 %v1331_v4, %v666_v62  ;;  %v1419_v49 = vsub.f32 %v1335_v5, %v664_v33 }
 0x199   : > { %v713_v1 = vmul.f32 1.442695, %v1416_v0  ;;  %v711_v2 = vmul.f32 1.442695, %v1419_v49 }
 0x19a   : > { %v668_v53 = vpop.xlane.xlu1 %667  ;;  %v682_v3 = vpop.xlane.xlu0 %681 }
 0x19b   : > { %1104 = vpow2.f32 %v713_v1  ;;  %v1425_v7 = vsub.f32 %v1343_v9, %v668_v53  ;;  %v1428_v52 = vsub.f32 %v1347_v10, %v682_v3 }
 0x19c   : > { %1106 = vpow2.f32 %v711_v2 }
 0x19d   : > { %v1101_v4 = vpop.eup %1100  ;;  %v729_v5 = vmul.f32 1.442695, %v1428_v52  ;;  %1108 = vpow2.f32 %v727_v6  ;;  %v715_v12 = vmul.f32 1.442695, %v1425_v7 }
 0x19e   : > { %v684_v8 = vpop.xlane.xlu1 %683  ;;  %741 = vadd.xlane.f32.xlu0 %v1101_v4  ;;  %v670_v11 = vpop.xlane.xlu0 %669 }
 0x19f   : > { %v1433_v13 = vsub.f32 %v1353_v19, %v684_v8  ;;  %v1436_v14 = vsub.f32 %v1359_v25, %v670_v11  ;;  %1110 = vpow2.f32 %v729_v5 }
 0x1a0   : > { %1112 = vpow2.f32 %v715_v12 }
 0x1a1   : > { %v1103_v9 = vpop.eup %1102  ;;  %v717_v10 = vmul.f32 1.442695, %v1436_v14  ;;  %v731_v17 = vmul.f32 1.442695, %v1433_v13 }
 0x1a2   : > { %v672_v15 = vpop.xlane.xlu1 %671  ;;  %757 = vadd.xlane.f32.xlu0 %v1103_v9  ;;  %v686_v16 = vpop.xlane.xlu0 %685 }
 0x1a3   : > { %v1441_v18 = vsub.f32 %v1367_v29, %v672_v15  ;;  %v1444_v20 = vsub.f32 %v1371_v30, %v686_v16  ;;  %1114 = vpow2.f32 %v717_v10 }
 0x1a4   : > { %1116 = vpow2.f32 %v731_v17 }
 0x1a5   : > { %v1105_v19 = vpop.eup %1104  ;;  %v733_v21 = vmul.f32 1.442695, %v1444_v20  ;;  %v719_v25 = vmul.f32 1.442695, %v1441_v18 }
 0x1a6   : > { %v1107_v22 = vpop.eup %1106  ;;  %v688_v23 = vpop.xlane.xlu1 %687  ;;  %745 = vadd.xlane.f32.xlu0 %v1105_v19 }
 0x1a7   : > { %v674_v24 = vpop.xlane.xlu0 %673  ;;  %v1449_v26 = vsub.f32 %v1377_v41, %v688_v23  ;;  %743 = vadd.xlane.f32.xlu1 %v1107_v22  ;;  %1118 = vpow2.f32 %v733_v21  ;;  %v1109_v28 = vpop.eup %1108 }
 0x1a8   : > { %v1452_v27 = vsub.f32 %v1383_v47, %v674_v24  ;;  %1120 = vpow2.f32 %v719_v25 }
 0x1a9   : > { %v1111_v30 = vpop.eup %1110  ;;  %v735_v34 = vmul.f32 1.442695, %v1449_v26 }
 0x1aa   : > { %v721_v29 = vmul.f32 1.442695, %v1452_v27  ;;  %v676_v31 = vpop.xlane.xlu1 %675  ;;  %761 = vadd.xlane.f32.xlu0 %v1111_v30  ;;  %v1113_v37 = vpop.eup %1112 }
 0x1ab   : > { %v690_v32 = vpop.xlane.xlu0 %689  ;;  %759 = vadd.xlane.f32.xlu1 %v1109_v28  ;;  %v1460_v36 = vsub.f32 %v1390_v50, %v676_v31 }
 0x1ac   : > { %v1457_v35 = vsub.f32 %v1394_v51, %v690_v32  ;;  %1122 = vpow2.f32 %v721_v29 }
 0x1ad   : > { %v1115_v40 = vpop.eup %1114  ;;  %1124 = vpow2.f32 %v735_v34  ;;  %v723_v42 = vmul.f32 1.442695, %v1460_v36 }
 0x1ae   : > { %v737_v39 = vmul.f32 1.442695, %v1457_v35  ;;  %v692_v41 = vpop.xlane.xlu1 %691  ;;  %749 = vadd.xlane.f32.xlu0 %v1115_v40  ;;  %v1117_v44 = vpop.eup %1116 }
 0x1af   : > { %747 = vadd.xlane.f32.xlu1 %v1113_v37  ;;  %v1465_v43 = vsub.f32 %v1401_v55, %v692_v41 }
 0x1b0   : > { %1126 = vpow2.f32 %v737_v39 }
 0x1b1   : > { %v1119_v45 = vpop.eup %1118  ;;  %1128 = vpow2.f32 %v723_v42  ;;  %v739_v46 = vmul.f32 1.442695, %v1465_v43 }
 0x1b2   : > { %765 = vadd.xlane.f32.xlu0 %v1119_v45  ;;  %v1121_v47 = vpop.eup %1120 }
 0x1b3   : > { %763 = vadd.xlane.f32.xlu1 %v1117_v44  ;;  %1130 = vpow2.f32 %v739_v46 }
 0x1b6   : > { %v1123_v48 = vpop.eup %1122 }
 0x1b7   : > { %751 = vadd.xlane.f32.xlu1 %v1121_v47  ;;  %753 = vadd.xlane.f32.xlu0 %v1123_v48  ;;  %v1125_v50 = vpop.eup %1124 }
 0x1ba   : > { %v1127_v51 = vpop.eup %1126 }
 0x1bb   : > { %767 = vadd.xlane.f32.xlu1 %v1125_v50  ;;  %769 = vadd.xlane.f32.xlu0 %v1127_v51  ;;  %v1129_v54 = vpop.eup %1128 }
 0x1bd   : > { %v1131_v55 = vpop.eup %1130 }
 0x1bf   : > { %755 = vadd.xlane.f32.xlu1 %v1129_v54 }
 0x1c3   : > { %771 = vadd.xlane.f32.xlu1 %v1131_v55 }
 0x22b   : > { %v742_v56 = vpop.xlane.xlu0 %741 }
 0x22c   : > { %1132 = vlog2.f32 %v742_v56 }
 0x22f   : > { %v758_v58 = vpop.xlane.xlu0 %757 }
 0x230   : > { %1134 = vlog2.f32 %v758_v58 }
 0x233   : > { %v746_v59 = vpop.xlane.xlu0 %745 }
 0x234   : > { %v744_v60 = vpop.xlane.xlu1 %743  ;;  %1136 = vlog2.f32 %v746_v59 }
 0x235   : > { %1138 = vlog2.f32 %v744_v60 }
 0x236   : > { %v1133_v61 = vpop.eup %1132 }
 0x237   : > { %v774_v62 = vmul.f32 0.6931472, %v1133_v61  ;;  %v762_v1 = vpop.xlane.xlu0 %761 }
 0x238   : > { %v760_v33 = vpop.xlane.xlu1 %759 }
 0x239   : > { %v805_v2 = vsub.f32 %v1405_v57, %v774_v62  ;;  %1140 = vlog2.f32 %v760_v33 }
 0x23a   : > { %v1135_v53 = vpop.eup %1134  ;;  %1142 = vlog2.f32 %v762_v1 }
 0x23b   : > { %821 = vst [vmem:[%s1473_s8] sm:$0xff] %v805_v2  ;;  %v790_v3 = vmul.f32 0.6931472, %v1135_v53  ;;  %v750_v4 = vpop.xlane.xlu0 %749 }
 0x23c   : > { %v748_v6 = vpop.xlane.xlu1 %747 }
 0x23d   : > { %v813_v5 = vsub.f32 %v1409_v38, %v790_v3  ;;  %1144 = vlog2.f32 %v748_v6 }
 0x23e   : > { %v1137_v8 = vpop.eup %1136  ;;  %1146 = vlog2.f32 %v750_v4 }
 0x23f   : > { %v1139_v11 = vpop.eup %1138  ;;  %829 = vst [vmem:[%s1473_s8 + $0x40] sm:$0xff] %v813_v5  ;;  %v778_v12 = vmul.f32 0.6931472, %v1137_v8  ;;  %v766_v57 = vpop.xlane.xlu0 %765 }
 0x240   : > { %v776_v9 = vmul.f32 0.6931472, %v1139_v11  ;;  %v764_v10 = vpop.xlane.xlu1 %763 }
 0x241   : > { %v807_v15 = vsub.f32 %v1416_v0, %v778_v12  ;;  %1148 = vlog2.f32 %v764_v10 }
 0x242   : > { %v806_v16 = vsub.f32 %v1419_v49, %v776_v9  ;;  %1150 = vlog2.f32 %v766_v57 }
 0x243   : > { %v1141_v17 = vpop.eup %1140  ;;  %823 = vst [vmem:[%s1473_s8 + $0x10] sm:$0xff] %v807_v15 }
 0x244   : > { %v1143_v38 = vpop.eup %1142  ;;  %822 = vst [vmem:[%s1473_s8 + $0x8] sm:$0xff] %v806_v16  ;;  %v792_v19 = vmul.f32 0.6931472, %v1141_v17  ;;  %v752_v21 = vpop.xlane.xlu1 %751 }
 0x245   : > { %v754_v22 = vpop.xlane.xlu0 %753  ;;  %v794_v23 = vmul.f32 0.6931472, %v1143_v38  ;;  %1152 = vlog2.f32 %v752_v21 }
 0x246   : > { %v814_v24 = vsub.f32 %v1413_v63, %v792_v19  ;;  %1154 = vlog2.f32 %v754_v22 }
 0x247   : > { %v1145_v0 = vpop.eup %1144  ;;  %v815_v25 = vsub.f32 %v1428_v52, %v794_v23 }
 0x248   : > { %v1147_v49 = vpop.eup %1146  ;;  %830 = vst [vmem:[%s1473_s8 + $0x48] sm:$0xff] %v814_v24  ;;  %v780_v28 = vmul.f32 0.6931472, %v1145_v0  ;;  %v768_v29 = vpop.xlane.xlu1 %767 }
 0x249   : > { %v770_v30 = vpop.xlane.xlu0 %769  ;;  %831 = vst [vmem:[%s1473_s8 + $0x50] sm:$0xff] %v815_v25  ;;  %v782_v31 = vmul.f32 0.6931472, %v1147_v49  ;;  %1156 = vlog2.f32 %v768_v29 }
 0x24a   : > { %v808_v32 = vsub.f32 %v1425_v7, %v780_v28  ;;  %1158 = vlog2.f32 %v770_v30 }
 0x24b   : > { %v1149_v34 = vpop.eup %1148  ;;  %v809_v63 = vsub.f32 %v1436_v14, %v782_v31 }
 0x24c   : > { %v1151_v37 = vpop.eup %1150  ;;  %824 = vst [vmem:[%s1473_s8 + $0x18] sm:$0xff] %v808_v32  ;;  %v796_v52 = vmul.f32 0.6931472, %v1149_v34  ;;  %v756_v39 = vpop.xlane.xlu1 %755 }
 0x24d   : > { %825 = vst [vmem:[%s1473_s8 + $0x20] sm:$0xff] %v809_v63  ;;  %v798_v40 = vmul.f32 0.6931472, %v1151_v37  ;;  %1160 = vlog2.f32 %v756_v39 }
 0x24e   : > { %v816_v41 = vsub.f32 %v1433_v13, %v796_v52 }
 0x24f   : > { %v1153_v42 = vpop.eup %1152  ;;  %v817_v44 = vsub.f32 %v1444_v20, %v798_v40 }
 0x250   : > { %v1155_v7 = vpop.eup %1154  ;;  %832 = vst [vmem:[%s1473_s8 + $0x58] sm:$0xff] %v816_v41  ;;  %v784_v45 = vmul.f32 0.6931472, %v1153_v42  ;;  %v772_v46 = vpop.xlane.xlu1 %771 }
 0x251   : > { %833 = vst [vmem:[%s1473_s8 + $0x60] sm:$0xff] %v817_v44  ;;  %v786_v14 = vmul.f32 0.6931472, %v1155_v7  ;;  %1162 = vlog2.f32 %v772_v46 }
 0x252   : > { %v810_v47 = vsub.f32 %v1441_v18, %v784_v45 }
 0x253   : > { %v1157_v48 = vpop.eup %1156  ;;  %v811_v50 = vsub.f32 %v1452_v27, %v786_v14 }
 0x254   : > { %v1159_v13 = vpop.eup %1158  ;;  %826 = vst [vmem:[%s1473_s8 + $0x28] sm:$0xff] %v810_v47  ;;  %v800_v51 = vmul.f32 0.6931472, %v1157_v48 }
 0x255   : > { %827 = vst [vmem:[%s1473_s8 + $0x30] sm:$0xff] %v811_v50  ;;  %v802_v20 = vmul.f32 0.6931472, %v1159_v13 }
 0x256   : > { %v818_v54 = vsub.f32 %v1449_v26, %v800_v51 }
 0x257   : > { %v1161_v55 = vpop.eup %1160  ;;  %v819_v56 = vsub.f32 %v1457_v35, %v802_v20 }
 0x258   : > { %834 = vst [vmem:[%s1473_s8 + $0x68] sm:$0xff] %v818_v54  ;;  %v788_v58 = vmul.f32 0.6931472, %v1161_v55 }
 0x259   : > { %835 = vst [vmem:[%s1473_s8 + $0x70] sm:$0xff] %v819_v56 }
 0x25a   : > { %v812_v18 = vsub.f32 %v1460_v36, %v788_v58 }
 0x25b   : > { %v1163_v59 = vpop.eup %1162 }
 0x25c   : > { %828 = vst [vmem:[%s1473_s8 + $0x38] sm:$0xff] %v812_v18  ;;  %v804_v60 = vmul.f32 0.6931472, %v1163_v59 }
 0x25e   : > { %v820_v27 = vsub.f32 %v1465_v43, %v804_v60 }
 0x260   : > { %836 = vst [vmem:[%s1473_s8 + $0x78] sm:$0xff] %v820_v27 }
 0x261 PF: > { %s13_s14 = sadd.s32 1, %s1186_s14   ;;  %s1520_s12 = smov %s1182_s13 }
 0x262   : > { %p10_p5 = scmp.ge.s32.totalorder %s13_s14, 4   ;;  %s1521_s13 = smov %s1523_s15 }
 0x264   :  { %12 = sbr.rel (!%p10_p5) target bundleno = 2 (0x2), region = 71 }

</bundles_post_ra>
